<compile_context>
chip_gen: v6e
topology: v6e:2x2x1
jax: 0.10.0
libtpu: 0.0.40
codegen_flags: <defaults>
</compile_context>

<pallas_src>
import jax
import jax.numpy as jnp
from jax.experimental import pallas as pl
from jax.experimental.pallas import tpu as pltpu


_TARGET_BLOCK_ELEMS = 2 * 1024 * 1024   # ~8 MiB per f32 x block
_LANE_CAP = 8192                        # max lane-tile width
_VMEM_LIMIT_BYTES = 48 << 20            # < v7x 64 MiB/TC physical; ample
                                        # headroom on v5e/v6e (128 MiB)


def _normalize_kernel(x_ref, mean_ref, inv_std_ref, o_ref):
    # mean/inv_std are either (TM, 1) sublane vectors (Layout A) or (1, TL)
    # lane vectors (Layout B); jnp broadcasting handles both identically.
    x = x_ref[...].astype(jnp.float32)
    o_ref[...] = ((x - mean_ref[...]) * inv_std_ref[...]).astype(o_ref.dtype)


def _choose_tiles(rows, lanes, itemsize):
    """Pick (TM, TL): lane-dense, ~8 MiB blocks, >=2 grid steps for large
    tensors so both v7x TensorCores are used."""
    row_unit, lane_unit = 8, 128
    # Lane tile first: full dim if it fits, else largest 128-multiple <= cap.
    tl = lanes if lanes <= _LANE_CAP else (_LANE_CAP // lane_unit) * lane_unit
    # Row tile from the remaining element budget.
    max_tm = max(_TARGET_BLOCK_ELEMS // max(tl, 1), row_unit)
    if rows <= max_tm:
        tm = rows
    else:
        tm = max((max_tm // row_unit) * row_unit, row_unit)
    # v7x megacore: a (1, 1) grid leaves one TensorCore idle; split big work.
    total_bytes = rows * lanes * itemsize
    if total_bytes >= (8 << 20) and pl.cdiv(rows, tm) * pl.cdiv(lanes, tl) < 2:
        if rows >= 2 * row_unit:
            tm = max((((rows + 1) // 2) // row_unit) * row_unit, row_unit)
        elif lanes >= 2 * lane_unit:
            tl = max((pl.cdiv(lanes, 2) // lane_unit) * lane_unit, lane_unit)
    return tm, tl


def normalize(x, mean, std, out_dtype=None):
    """x: (N, C, H, W); mean/std: (C,).  Returns (x - mean) / std per channel."""
    N, C, H, W = x.shape
    HW = H * W
    out_dtype = x.dtype if out_dtype is None else jnp.dtype(out_dtype)

    # Per-channel stats in f32; reciprocal computed once here (C values), so
    # the kernel body is one sub + one mul per element (VALU has huge slack).
    mean_f32 = jnp.asarray(mean, dtype=jnp.float32).reshape(C)
    inv_std_f32 = 1.0 / jnp.asarray(std, dtype=jnp.float32).reshape(C)

    if HW % 128 == 0 and HW >= 1024:
        # Layout A: channel rows, sublane-broadcast stats.
        rows, lanes = N * C, HW
        x2 = x.reshape(rows, lanes)
        mean_arg = jnp.tile(mean_f32, N).reshape(rows, 1)
        inv_std_arg = jnp.tile(inv_std_f32, N).reshape(rows, 1)
        tm, tl = _choose_tiles(rows, lanes, x.dtype.itemsize)
        # (i, 0): constant across the inner (lane) grid axis -> no re-DMA.
        stat_spec = pl.BlockSpec((tm, 1), lambda i, j: (i, 0))
    else:
        # Layout B: image rows, lane-broadcast stats (lane-dense for small HW).
        rows, lanes = N, C * HW
        x2 = x.reshape(rows, lanes)
        mean_arg = jnp.repeat(mean_f32, HW).reshape(1, lanes)
        inv_std_arg = jnp.repeat(inv_std_f32, HW).reshape(1, lanes)
        tm, tl = _choose_tiles(rows, lanes, x.dtype.itemsize)
        stat_spec = pl.BlockSpec((1, tl), lambda i, j: (0, j))

    # Rows outer, lanes inner (keeps Layout A stats resident across the
    # fast-moving axis).
    grid = (pl.cdiv(rows, tm), pl.cdiv(lanes, tl))

    total = rows * lanes
    cost = pl.CostEstimate(
        flops=2 * total,
        transcendentals=0,
        bytes_accessed=total * (x.dtype.itemsize + out_dtype.itemsize)
        + 2 * 4 * mean_arg.size,
    )

    out2 = pl.pallas_call(
        _normalize_kernel,
        out_shape=jax.ShapeDtypeStruct((rows, lanes), out_dtype),
        grid_spec=pltpu.PrefetchScalarGridSpec(
            num_scalar_prefetch=0,
            grid=grid,
            in_specs=[
                pl.BlockSpec((tm, tl), lambda i, j: (i, j)),
                stat_spec,
                stat_spec,
            ],
            out_specs=pl.BlockSpec((tm, tl), lambda i, j: (i, j)),
        ),
        compiler_params=pltpu.CompilerParams(
            dimension_semantics=("parallel", "parallel"),
            vmem_limit_bytes=_VMEM_LIMIT_BYTES,
        ),
        cost_estimate=cost,
    )(x2, mean_arg, inv_std_arg)

    return out2.reshape(N, C, H, W)


if __name__ == "__main__":
    key = jax.random.PRNGKey(0)
    N, C, H, W = 2, 4, 16, 16

    x = jax.random.normal(key, (N, C, H, W), dtype=jnp.float32)
    # Deterministic per-channel "buffer" values (as registered in __init__).
    mean = jnp.array([0.485, 0.456, 0.406, 0.5], dtype=jnp.float32)
    std = jnp.array([0.229, 0.224, 0.225, 0.25], dtype=jnp.float32)

    out = normalize(x, mean, std)
    jax.block_until_ready(out)

    # Reference check in plain JAX (same semantics as the PyTorch forward).
    ref = (x - mean[None, :, None, None]) / std[None, :, None, None]
    assert out.shape == (N, C, H, W)
    assert jnp.allclose(out, ref, atol=1e-5, rtol=1e-5)

    print("KERNEL_OK")
</pallas_src>

<mosaic_0001>
module attributes {stable_mosaic.version = 11 : i64} {
  func.func @_normalize_kernel(%arg0: i32, %arg1: i32, %arg2: memref<2x1024xf32, #tpu.memory_space<vmem>>, %arg3: memref<1x1024xf32, #tpu.memory_space<vmem>>, %arg4: memref<1x1024xf32, #tpu.memory_space<vmem>>, %arg5: memref<2x1024xf32, #tpu.memory_space<vmem>>) attributes {dimension_semantics = [#tpu.dimension_semantics<parallel>, #tpu.dimension_semantics<parallel>], iteration_bounds = array<i64: 1, 1>, scalar_prefetch = 0 : i64, scratch_operands = 0 : i64, tpu.core_type = #tpu.core_type<tc>, window_params = [{transform_indices = @transform_0, window_bounds = array<i64: 2, 1024>}, {transform_indices = @transform_1, window_bounds = array<i64: 1, 1024>}, {transform_indices = @transform_2, window_bounds = array<i64: 1, 1024>}, {transform_indices = @transform_3, window_bounds = array<i64: 2, 1024>}]} {
    %c0 = arith.constant 0 : index
    %c0_0 = arith.constant 0 : index
    %0 = vector.load %arg2[%c0, %c0_0] : memref<2x1024xf32, #tpu.memory_space<vmem>>, vector<2x1024xf32>
    %c0_1 = arith.constant 0 : index
    %c0_2 = arith.constant 0 : index
    %1 = vector.load %arg3[%c0_1, %c0_2] : memref<1x1024xf32, #tpu.memory_space<vmem>>, vector<1x1024xf32>
    %2 = vector.broadcast %1 : vector<1x1024xf32> to vector<2x1024xf32>
    %3 = arith.subf %0, %2 : vector<2x1024xf32>
    %c0_3 = arith.constant 0 : index
    %c0_4 = arith.constant 0 : index
    %4 = vector.load %arg4[%c0_3, %c0_4] : memref<1x1024xf32, #tpu.memory_space<vmem>>, vector<1x1024xf32>
    %5 = vector.broadcast %4 : vector<1x1024xf32> to vector<2x1024xf32>
    %6 = arith.mulf %3, %5 : vector<2x1024xf32>
    %c0_5 = arith.constant 0 : index
    %c0_6 = arith.constant 0 : index
    %7 = vector.load %arg5[%c0_5, %c0_6] : memref<2x1024xf32, #tpu.memory_space<vmem>>, vector<2x1024xf32>
    tpu.vector_store %arg5[%c0_5, %c0_6], %6 {strides = array<i32>} : memref<2x1024xf32, #tpu.memory_space<vmem>>, vector<2x1024xf32>,
    return
  }
  func.func @transform_0(%arg0: i32, %arg1: i32) -> (i32, i32) {
    %c0_i32 = arith.constant 0 : i32
    return %arg0, %arg1 : i32, i32
  }
  func.func @transform_1(%arg0: i32, %arg1: i32) -> (i32, i32) {
    %c0_i32 = arith.constant 0 : i32
    %c0_i32_0 = arith.constant 0 : i32
    return %c0_i32, %arg1 : i32, i32
  }
  func.func @transform_2(%arg0: i32, %arg1: i32) -> (i32, i32) {
    %c0_i32 = arith.constant 0 : i32
    %c0_i32_0 = arith.constant 0 : i32
    return %c0_i32, %arg1 : i32, i32
  }
  func.func @transform_3(%arg0: i32, %arg1: i32) -> (i32, i32) {
    %c0_i32 = arith.constant 0 : i32
    return %arg0, %arg1 : i32, i32
  }
}

</mosaic_0001>

<bundles_post_ra>
// kernel: tpu_custom_call.1
= control target key start
LH: loop header
LB: loop body
LE: loop exit
PB: predicated region body
PF: predicated region fallthrough
CT: control target
= control target key end

     0   :  { %8 = vsyncpa [#allocation3], 0  ;;  %s342_s0 = inlined_call_operand.hbm [shape: f32[2,1024], index: 0, kind: input, shape index: {}]   ;;  %s343_s1 = inlined_call_operand.hbm [shape: f32[1,1024], index: 1, kind: input, shape index: {}]   ;;  %s344_s2 = inlined_call_operand.hbm [shape: f32[1,1024], index: 2, kind: input, shape index: {}]   ;;  %s345_s3 = inlined_call_operand.hbm [shape: f32[2,1024], index: 3, kind: output, shape index: {}]  }
   0x1   :  { %9 = vsyncpa [#allocation6], 0 }
   0x2   :  { %10 = vsyncpa [#allocation4], 0  ;;  %s305_s12 = smov [#allocation5]   ;;  %s306_s14 = smov [#allocation2]  }
   0x3   :  { %s27_s13 = sshll.u32 %s305_s12, 4  ;;  %s17_s15 = sshll.u32 %s306_s14, 4  ;;  %s28_s13 = int_to_ptr.vmem [resolvable:$true] %s27_s13  ;;  %s18_s15 = int_to_ptr.vmem [resolvable:$true] %s17_s15 }
   0x4   :  { %s227_s16 = scalar_lea.vmem %s28_s13, 128  ;;  %p232_p1 = scmp.lt.s32.totalorder %s28_s13, %s28_s13 }
   0x5   :  { %p228_p0 = scmp.ne.s32.totalorder %s28_s13, %s227_s16  ;;  %p233_p2 = scmp.lt.s32.totalorder %s227_s16, %s227_s16 }
   0x7   :  { %p234_p3 = por %p233_p2, %p232_p1 }
   0x9   :  { %p235_p4 = pnand %p234_p3, %p228_p0 }
   0xb   :  { %238 = shalt.err (!%p235_p4)
}
   0xc   :  { %30 = dma.hbm_to_vmem [thread:$0]  %s343_s1, 128, %s28_s13, [#allocation6]  }
   0xd   :  { %s247_s19 = scalar_lea.vmem %s18_s15, 256  ;;  %p252_p6 = scmp.lt.s32.totalorder %s18_s15, %s18_s15 }
   0xe   :  { %p248_p5 = scmp.ne.s32.totalorder %s18_s15, %s247_s19  ;;  %p253_p7 = scmp.lt.s32.totalorder %s247_s19, %s247_s19 }
  0x10   :  { %p254_p8 = por %p253_p7, %p252_p6 }
  0x12   :  { %p255_p9 = pnand %p254_p8, %p248_p5 }
  0x14   :  { %258 = shalt.err (!%p255_p9)
}
  0x15   :  { %20 = dma.hbm_to_vmem [thread:$0]  %s342_s0, 256, %s18_s15, [#allocation3]  }
  0x16   :  { %s307_s22 = smov [#allocation7]  }
  0x17   :  { %s37_s23 = sshll.u32 %s307_s22, 4  ;;  %s38_s23 = int_to_ptr.vmem [resolvable:$true] %s37_s23 }
  0x18   :  { %s267_s24 = scalar_lea.vmem %s38_s23, 128  ;;  %p272_p11 = scmp.lt.s32.totalorder %s38_s23, %s38_s23 }
  0x19   :  { %p268_p10 = scmp.ne.s32.totalorder %s38_s23, %s267_s24  ;;  %p273_p12 = scmp.lt.s32.totalorder %s267_s24, %s267_s24 }
  0x1b   :  { %p274_p13 = por %p273_p12, %p272_p11 }
  0x1d   :  { %p275_p0 = pnand %p274_p13, %p268_p10 }
  0x1f   :  { %278 = shalt.err (!%p275_p0)
}
  0x20   :  { %40 = dma.hbm_to_vmem [thread:$0]  %s344_s2, 128, %s38_s23, [#allocation6]  }
  0x21   :  { %299 = dma.done.wait [#allocation3], 256  }
  0x22   :  { %300 = vsyncadd [#allocation3], 4294967040 }
  0x23   :  { %301 = dma.done.wait [#allocation6], 256  }
  0x24   :  { %302 = vsyncadd [#allocation6], 4294967040  ;;  %v54_v0 = vlaneseq  ;;  %v308_v1 = vmov 1983009808   ;;  %v52_v11 = vld [vmem:[#allocation5] sm:$0xff]  ;;  %v124_v13 = vld [vmem:[#allocation7] sm:$0xff] }
  0x25   :  { %v89_v2 = vunpack.c.l.s4 %v308_v1  ;;  %v50_v36 = vld [vmem:[#allocation2] sm:$0xff]  ;;  %v51_v49 = vld [vmem:[#allocation2 + $0x8] sm:$0xff]  ;;  %s309_s0 = smov [#allocation8]  }
  0x26   :  { %v55_v3 = vshrl.u32 %v54_v0, 7  ;;  %s204_s2 = sshll.u32 %s309_s0, 4  ;;  %s205_s2 = int_to_ptr.vmem [resolvable:$true] %s204_s2 }
  0x27   :  { %v90_v4 = vunpack.c.0.s8 %v89_v2  ;;  %s279_s26 = scalar_lea.vmem %s205_s2, 256  ;;  %p284_p2 = scmp.lt.s32.totalorder %s205_s2, %s205_s2 }
  0x28   :  { %v56_v5 = vsub.s32 0, %v55_v3  ;;  %v60_v6 = vsub.s32 1, %v55_v3  ;;  %v64_v7 = vsub.s32 2, %v55_v3  ;;  %v68_v8 = vsub.s32 3, %v55_v3  ;;  %p280_p1 = scmp.ne.s32.totalorder %s205_s2, %s279_s26  ;;  %p285_p3 = scmp.lt.s32.totalorder %s279_s26, %s279_s26 }
  0x29   :  { %v72_v9 = vsub.s32 4, %v55_v3  ;;  %v76_v10 = vsub.s32 5, %v55_v3  ;;  %v93_v12 = vsub.s32 %v90_v4, %v55_v3  ;;  %v80_v14 = vsub.s32 6, %v55_v3 }
  0x2a   :  { %v84_v15 = vsub.s32 7, %v55_v3  ;;  %v57_v16 = vrot.slane %v52_v11, %v56_v5  ;;  %v61_v17 = vrot.slane %v52_v11, %v60_v6  ;;  %v65_v18 = vrot.slane %v52_v11, %v64_v7  ;;  %p286_p4 = por %p285_p3, %p284_p2 }
  0x2b   :  { %v69_v19 = vrot.slane %v52_v11, %v68_v8  ;;  %v129_v20 = vrot.slane %v124_v13, %v56_v5  ;;  %v133_v21 = vrot.slane %v124_v13, %v60_v6  ;;  %v137_v22 = vrot.slane %v124_v13, %v64_v7 }
  0x2c   :  { %v141_v23 = vrot.slane %v124_v13, %v68_v8  ;;  %v86_v24 = vcombine.low %v57_v16, %v61_v17  ;;  %v73_v26 = vrot.slane %v52_v11, %v72_v9  ;;  %v77_v27 = vrot.slane %v52_v11, %v76_v10  ;;  %p287_p5 = pnand %p286_p4, %p280_p1 }
  0x2d   :  { %v87_v25 = vcombine.low %v65_v18, %v69_v19  ;;  %v158_v28 = vcombine.low %v129_v20, %v133_v21  ;;  %v81_v30 = vrot.slane %v52_v11, %v80_v14  ;;  %v85_v31 = vrot.slane %v52_v11, %v84_v15 }
  0x2e   :  { %v159_v29 = vcombine.low %v137_v22, %v141_v23  ;;  %v94_v32 = vrot.slane %v86_v24, %v93_v12  ;;  %v103_v34 = vcombine.low %v73_v26, %v77_v27  ;;  %v145_v35 = vrot.slane %v124_v13, %v72_v9 }
  0x2f   :  { %v101_v33 = vrot.slane %v87_v25, %v93_v12  ;;  %v166_v37 = vrot.slane %v158_v28, %v93_v12  ;;  %v104_v39 = vcombine.low %v81_v30, %v85_v31  ;;  %v149_v40 = vrot.slane %v124_v13, %v76_v10 }
  0x30   :  { %v173_v38 = vrot.slane %v159_v29, %v93_v12  ;;  %v111_v42 = vrot.slane %v103_v34, %v93_v12  ;;  %v153_v43 = vrot.slane %v124_v13, %v80_v14  ;;  %v157_v44 = vrot.slane %v124_v13, %v84_v15 }
  0x31   :  { %v102_v41 = vcombine.low %v94_v32, %v101_v33  ;;  %v118_v46 = vrot.slane %v104_v39, %v93_v12  ;;  %v175_v47 = vcombine.low %v145_v35, %v149_v40 }
  0x32   :  { %v174_v45 = vcombine.low %v166_v37, %v173_v38  ;;  %v176_v50 = vcombine.low %v153_v43, %v157_v44 }
  0x33   :  { %v122_v48 = vsub.f32 %v50_v36, %v102_v41  ;;  %v119_v51 = vcombine.low %v111_v42, %v118_v46  ;;  %v183_v52 = vrot.slane %v175_v47, %v93_v12 }
  0x34   :  { %v190_v54 = vrot.slane %v176_v50, %v93_v12 }
  0x35   :  { %v194_v53 = vmul.f32 %v174_v45, %v122_v48  ;;  %v123_v55 = vsub.f32 %v51_v49, %v119_v51 }
  0x36   :  { %v191_v56 = vcombine.low %v183_v52, %v190_v54 }
  0x37   :  { %196 = vst [vmem:[#allocation8] sm:$0xff] %v194_v53 }
  0x38   :  { %v195_v57 = vmul.f32 %v191_v56, %v123_v55 }
  0x3a   :  { %197 = vst [vmem:[#allocation8 + $0x8] sm:$0xff] %v195_v57 }
  0x3b   :  { %290 = shalt.err (!%p287_p5)
}
  0x3c   :  { %207 = dma.vmem_to_hbm [thread:$0]  %s205_s2, 256, %s345_s3, [#allocation4]  }
  0x3d   :  { %303 = dma.done.wait [#allocation4], 256  }
  0x3e   :  { %304 = vsyncadd [#allocation4], 4294967040 }
  0x3f   :  { %211 = vsyncpa [#allocation3], 1 }
  0x40   :  { %212 = vsyncpa [#allocation6], 1 }
  0x41   :  { %213 = vsyncpa [#allocation4], 1 }

</bundles_post_ra>
